<compile_context>
chip_gen: v7x
topology: tpu7x:2x2x1
jax: 0.10.0
libtpu: 0.0.40
codegen_flags: <defaults>
</compile_context>

<pallas_src>
import functools

import numpy as np

import jax
import jax.numpy as jnp
from jax import lax
from jax.experimental import pallas as pl
from jax.experimental.pallas import tpu as pltpu


def _border_matrix(length, ksize, border):
    """(length, length) matrix M with (M @ v)[i] = sum_{t=-p..p} v[border_map(i+t)].

    Entries are small non-negative integers (edge taps can coincide), so the
    matrix is exact even in bf16.  The 1/(kh*kw) scale is applied separately.
    """
    pad = (ksize - 1) // 2
    m = np.zeros((length, length), dtype=np.float32)
    rows = np.arange(length)
    for t in range(-pad, pad + 1):
        j = rows + t
        if border == "constant":
            valid = (j >= 0) & (j < length)
            np.add.at(m, (rows[valid], j[valid]), 1.0)
        elif border == "replicate":
            np.add.at(m, (rows, np.clip(j, 0, length - 1)), 1.0)
        elif border == "circular":
            np.add.at(m, (rows, np.mod(j, length)), 1.0)
        elif border == "reflect":
            jj = np.where(j < 0, -j, j)
            jj = np.where(jj > length - 1, 2 * (length - 1) - jj, jj)
            np.add.at(m, (rows, jj), 1.0)
        else:
            raise ValueError(f"unsupported border_type: {border}")
    return m


def _box_blur_kernel(bh_ref, bwt_ref, x_ref, o_ref, *, tbc, scale, unroll):
    # bh_ref : (H, H) f32 row-blur matrix (border rule baked in).
    # bwt_ref: (W, W) transposed column-blur matrix in the input dtype.
    # x_ref  : (tbc, H, W) input images;  o_ref: (tbc, H, W) output.
    bh = bh_ref[...]
    bwt = bwt_ref[...]

    def blur_one(b):
        xb = x_ref[b]                                                # (H, W)
        t = jnp.dot(xb, bwt, preferred_element_type=jnp.float32)    # col pass
        y = jnp.dot(bh, t, preferred_element_type=jnp.float32)      # row pass
        o_ref[b] = (y * scale).astype(o_ref.dtype)

    if unroll:
        for b in range(tbc):
            blur_one(b)
    else:
        def body(b, carry):
            blur_one(b)
            return carry
        lax.fori_loop(0, tbc, body, 0)


def _num_tensorcores():
    try:
        info = pltpu.get_tpu_info()
        for name in ("num_cores", "core_count", "num_tensorcores",
                     "tensorcores_per_chip", "num_tensor_cores"):
            v = getattr(info, name, None)
            if isinstance(v, int) and v > 0:
                return v
    except Exception:
        pass
    return 1  # v5e/v6e: single TensorCore -> don't split tiles needlessly


def _vmem_limit_bytes():
    try:
        cap = int(pltpu.get_tpu_info().vmem_capacity_bytes)
    except Exception:
        cap = 64 * 1024 * 1024  # v7x per-TC size is the safest fallback
    # ~80% of physical VMEM: ~102 MiB on v5e/v6e (128 MiB), ~51 MiB on v7x.
    return max(32 * 1024 * 1024, int(cap * 0.8))


def _choose_tbc(BC, H, W, itemsize, budget, num_cores):
    # Per-image footprint: double-buffered input + output tiles only (the f32
    # temporaries are per-image (H, W) and counted in the fixed overhead).
    per_img = 4 * H * W * itemsize
    cap = max(1, int(budget) // per_img)
    if num_cores > 1 and BC > 1:
        # Keep at least `num_cores` grid steps so every TensorCore gets work.
        cap = min(cap, max(1, pl.cdiv(BC, num_cores)))
    return int(min(cap, BC))


def box_blur(x, kernel_size=(3, 3), border_type="reflect", normalized=True):
    """x: (B, C, H, W) float array. Returns blurred (B, C, H, W) (kornia BoxBlur)."""
    B, C, H, W = x.shape
    kh, kw = kernel_size
    # TODO(synk): kornia pads even kernel sizes asymmetrically; only odd sizes here.
    assert kh % 2 == 1 and kw % 2 == 1, "only odd kernel sizes are supported"
    ph, pw = (kh - 1) // 2, (kw - 1) // 2
    if border_type == "reflect":
        assert ph <= H - 1 and pw <= W - 1, "reflect pad must be < spatial size"
    elif border_type == "circular":
        assert ph <= H and pw <= W, "circular pad must be <= spatial size"
    elif border_type not in ("constant", "replicate"):
        raise ValueError(f"unsupported border_type: {border_type}")

    # get_box_kernel2d already yields uniform 1/(kh*kw) taps and
    # normalize_kernel2d is a no-op on them; BoxBlur.forward never re-normalizes,
    # so the scale is always 1/(kh*kw) regardless of `normalized`.
    del normalized
    scale = 1.0 / float(kh * kw)

    mat_dtype = x.dtype if jnp.issubdtype(x.dtype, jnp.floating) else jnp.float32
    bh = jnp.asarray(_border_matrix(H, kh, border_type), dtype=jnp.float32)
    bwt = jnp.asarray(_border_matrix(W, kw, border_type).T, dtype=mat_dtype)

    BC = B * C
    x_flat = x.reshape(BC, H, W)
    itemsize = int(jnp.dtype(x.dtype).itemsize)

    vmem_limit = _vmem_limit_bytes()
    # Fixed VMEM overhead: resident blur matrices (double-buffered), per-image
    # f32 matmul temporaries, plus headroom.
    fixed = 2 * (H * H + W * W) * 4 + 2 * H * W * 4 + (2 << 20)
    budget = max(4 * H * W * itemsize, vmem_limit - fixed)
    tbc = _choose_tbc(BC, H, W, itemsize, budget, _num_tensorcores())
    # TODO(synk): H-tiling with a (kh-1)-row halo for images whose working set
    # exceeds VMEM even at tbc=1 (relevant on v7x's 64 MiB VMEM).

    grid = (pl.cdiv(BC, tbc),)          # partial last block allowed
    unroll = tbc <= 16

    kernel_fn = functools.partial(_box_blur_kernel, tbc=tbc, scale=scale,
                                  unroll=unroll)

    out_flat = pl.pallas_call(
        kernel_fn,
        out_shape=jax.ShapeDtypeStruct((BC, H, W), x.dtype),
        grid_spec=pltpu.PrefetchScalarGridSpec(
            num_scalar_prefetch=0,
            grid=grid,
            in_specs=[
                # Blur matrices map to the same block every step -> resident.
                pl.BlockSpec((H, H), lambda b: (0, 0)),
                pl.BlockSpec((W, W), lambda b: (0, 0)),
                # Full (H, W) per image: last two block dims equal the array
                # dims, so the (8,128) divisibility rule never bites.
                pl.BlockSpec((tbc, H, W), lambda b: (b, 0, 0)),
            ],
            out_specs=pl.BlockSpec((tbc, H, W), lambda b: (b, 0, 0)),
        ),
        compiler_params=pltpu.CompilerParams(
            dimension_semantics=("parallel",),
            vmem_limit_bytes=vmem_limit,
        ),
    )(bh, bwt, x_flat)

    return out_flat.reshape(B, C, H, W)


def _reference(x, kernel_size=(3, 3), border_type="reflect"):
    # Pure-JAX reference: pad + dense box filter, f32 accumulation.
    kh, kw = kernel_size
    ph, pw = (kh - 1) // 2, (kw - 1) // 2
    mode = {"reflect": "reflect", "replicate": "edge",
            "circular": "wrap", "constant": "constant"}[border_type]
    xp = jnp.pad(x, ((0, 0), (0, 0), (ph, ph), (pw, pw)), mode=mode)
    B, C, H, W = x.shape
    acc = jnp.zeros(x.shape, dtype=jnp.float32)
    for i in range(kh):
        for j in range(kw):
            acc = acc + xp[:, :, i:i + H, j:j + W].astype(jnp.float32)
    return (acc / (kh * kw)).astype(x.dtype)


if __name__ == "__main__":
    key = jax.random.PRNGKey(0)
    B, C, H, W = 2, 4, 16, 16
    x = jax.random.uniform(key, (B, C, H, W), dtype=jnp.float32)

    out = box_blur(x, kernel_size=(3, 3), border_type="reflect", normalized=True)
    out = jax.block_until_ready(out)
    ref = _reference(x, (3, 3), "reflect")
    assert out.shape == (B, C, H, W)
    assert jnp.max(jnp.abs(out - ref)) < 1e-5

    out5 = box_blur(x, kernel_size=(5, 5), border_type="replicate", normalized=True)
    out5 = jax.block_until_ready(out5)
    ref5 = _reference(x, (5, 5), "replicate")
    assert jnp.max(jnp.abs(out5 - ref5)) < 1e-5

    print("KERNEL_OK")
</pallas_src>

<mosaic_0001>
module attributes {stable_mosaic.version = 11 : i64} {
  func.func @_box_blur_kernel(%arg0: i32, %arg1: memref<16x16xf32, #tpu.memory_space<vmem>>, %arg2: memref<16x16xf32, #tpu.memory_space<vmem>>, %arg3: memref<8x16x16xf32, #tpu.memory_space<vmem>>, %arg4: memref<8x16x16xf32, #tpu.memory_space<vmem>>) attributes {dimension_semantics = [#tpu.dimension_semantics<parallel>], iteration_bounds = array<i64: 1>, scalar_prefetch = 0 : i64, scratch_operands = 0 : i64, tpu.core_type = #tpu.core_type<tc>, window_params = [{pipeline_mode = #tpu.pipeline_mode<synchronous>, transform_indices = @transform_0, window_bounds = array<i64: 16, 16>}, {pipeline_mode = #tpu.pipeline_mode<synchronous>, transform_indices = @transform_1, window_bounds = array<i64: 16, 16>}, {transform_indices = @transform_2, window_bounds = array<i64: 8, 16, 16>}, {transform_indices = @transform_3, window_bounds = array<i64: 8, 16, 16>}]} {
    %c0 = arith.constant 0 : index
    %c0_0 = arith.constant 0 : index
    %0 = vector.load %arg1[%c0, %c0_0] : memref<16x16xf32, #tpu.memory_space<vmem>>, vector<16x16xf32>
    %c0_1 = arith.constant 0 : index
    %c0_2 = arith.constant 0 : index
    %1 = vector.load %arg2[%c0_1, %c0_2] : memref<16x16xf32, #tpu.memory_space<vmem>>, vector<16x16xf32>
    %c0_3 = arith.constant 0 : index
    %c0_4 = arith.constant 0 : index
    %c0_5 = arith.constant 0 : index
    %2 = vector.load %arg3[%c0_3, %c0_4, %c0_5] : memref<8x16x16xf32, #tpu.memory_space<vmem>>, vector<1x16x16xf32>
    %3 = vector.shape_cast %2 : vector<1x16x16xf32> to vector<16x16xf32>
    %cst = arith.constant dense<0.000000e+00> : vector<16x16xf32>
    %4 = tpu.matmul %3, %1, %cst {dimension_numbers = #tpu.dot_dimension_numbers<[1], [0], [0], [1], [0, 0, 1, 1], [], []>} : vector<16x16xf32>, vector<16x16xf32>, vector<16x16xf32> -> vector<16x16xf32>
    %cst_6 = arith.constant dense<0.000000e+00> : vector<16x16xf32>
    %5 = tpu.matmul %0, %4, %cst_6 {dimension_numbers = #tpu.dot_dimension_numbers<[1], [0], [0], [1], [0, 0, 1, 1], [], []>} : vector<16x16xf32>, vector<16x16xf32>, vector<16x16xf32> -> vector<16x16xf32>
    %cst_7 = arith.constant 0.111111112 : f32
    %6 = vector.broadcast %cst_7 : f32 to vector<16x16xf32>
    %7 = arith.mulf %5, %6 : vector<16x16xf32>
    %c0_8 = arith.constant 0 : index
    %c0_9 = arith.constant 0 : index
    %c0_10 = arith.constant 0 : index
    %8 = vector.load %arg4[%c0_8, %c0_9, %c0_10] : memref<8x16x16xf32, #tpu.memory_space<vmem>>, vector<1x16x16xf32>
    %9 = vector.shape_cast %8 : vector<1x16x16xf32> to vector<16x16xf32>
    %10 = vector.shape_cast %7 : vector<16x16xf32> to vector<1x16x16xf32>
    tpu.vector_store %arg4[%c0_8, %c0_9, %c0_10], %10 {strides = array<i32>} : memref<8x16x16xf32, #tpu.memory_space<vmem>>, vector<1x16x16xf32>,
    %c1 = arith.constant 1 : index
    %c0_11 = arith.constant 0 : index
    %c0_12 = arith.constant 0 : index
    %11 = vector.load %arg3[%c1, %c0_11, %c0_12] : memref<8x16x16xf32, #tpu.memory_space<vmem>>, vector<1x16x16xf32>
    %12 = vector.shape_cast %11 : vector<1x16x16xf32> to vector<16x16xf32>
    %cst_13 = arith.constant dense<0.000000e+00> : vector<16x16xf32>
    %13 = tpu.matmul %12, %1, %cst_13 {dimension_numbers = #tpu.dot_dimension_numbers<[1], [0], [0], [1], [0, 0, 1, 1], [], []>} : vector<16x16xf32>, vector<16x16xf32>, vector<16x16xf32> -> vector<16x16xf32>
    %cst_14 = arith.constant dense<0.000000e+00> : vector<16x16xf32>
    %14 = tpu.matmul %0, %13, %cst_14 {dimension_numbers = #tpu.dot_dimension_numbers<[1], [0], [0], [1], [0, 0, 1, 1], [], []>} : vector<16x16xf32>, vector<16x16xf32>, vector<16x16xf32> -> vector<16x16xf32>
    %cst_15 = arith.constant 0.111111112 : f32
    %15 = vector.broadcast %cst_15 : f32 to vector<16x16xf32>
    %16 = arith.mulf %14, %15 : vector<16x16xf32>
    %c1_16 = arith.constant 1 : index
    %c0_17 = arith.constant 0 : index
    %c0_18 = arith.constant 0 : index
    %17 = vector.load %arg4[%c1_16, %c0_17, %c0_18] : memref<8x16x16xf32, #tpu.memory_space<vmem>>, vector<1x16x16xf32>
    %18 = vector.shape_cast %17 : vector<1x16x16xf32> to vector<16x16xf32>
    %19 = vector.shape_cast %16 : vector<16x16xf32> to vector<1x16x16xf32>
    tpu.vector_store %arg4[%c1_16, %c0_17, %c0_18], %19 {strides = array<i32>} : memref<8x16x16xf32, #tpu.memory_space<vmem>>, vector<1x16x16xf32>,
    %c2 = arith.constant 2 : index
    %c0_19 = arith.constant 0 : index
    %c0_20 = arith.constant 0 : index
    %20 = vector.load %arg3[%c2, %c0_19, %c0_20] : memref<8x16x16xf32, #tpu.memory_space<vmem>>, vector<1x16x16xf32>
    %21 = vector.shape_cast %20 : vector<1x16x16xf32> to vector<16x16xf32>
    %cst_21 = arith.constant dense<0.000000e+00> : vector<16x16xf32>
    %22 = tpu.matmul %21, %1, %cst_21 {dimension_numbers = #tpu.dot_dimension_numbers<[1], [0], [0], [1], [0, 0, 1, 1], [], []>} : vector<16x16xf32>, vector<16x16xf32>, vector<16x16xf32> -> vector<16x16xf32>
    %cst_22 = arith.constant dense<0.000000e+00> : vector<16x16xf32>
    %23 = tpu.matmul %0, %22, %cst_22 {dimension_numbers = #tpu.dot_dimension_numbers<[1], [0], [0], [1], [0, 0, 1, 1], [], []>} : vector<16x16xf32>, vector<16x16xf32>, vector<16x16xf32> -> vector<16x16xf32>
    %cst_23 = arith.constant 0.111111112 : f32
    %24 = vector.broadcast %cst_23 : f32 to vector<16x16xf32>
    %25 = arith.mulf %23, %24 : vector<16x16xf32>
    %c2_24 = arith.constant 2 : index
    %c0_25 = arith.constant 0 : index
    %c0_26 = arith.constant 0 : index
    %26 = vector.load %arg4[%c2_24, %c0_25, %c0_26] : memref<8x16x16xf32, #tpu.memory_space<vmem>>, vector<1x16x16xf32>
    %27 = vector.shape_cast %26 : vector<1x16x16xf32> to vector<16x16xf32>
    %28 = vector.shape_cast %25 : vector<16x16xf32> to vector<1x16x16xf32>
    tpu.vector_store %arg4[%c2_24, %c0_25, %c0_26], %28 {strides = array<i32>} : memref<8x16x16xf32, #tpu.memory_space<vmem>>, vector<1x16x16xf32>,
    %c3 = arith.constant 3 : index
    %c0_27 = arith.constant 0 : index
    %c0_28 = arith.constant 0 : index
    %29 = vector.load %arg3[%c3, %c0_27, %c0_28] : memref<8x16x16xf32, #tpu.memory_space<vmem>>, vector<1x16x16xf32>
    %30 = vector.shape_cast %29 : vector<1x16x16xf32> to vector<16x16xf32>
    %cst_29 = arith.constant dense<0.000000e+00> : vector<16x16xf32>
    %31 = tpu.matmul %30, %1, %cst_29 {dimension_numbers = #tpu.dot_dimension_numbers<[1], [0], [0], [1], [0, 0, 1, 1], [], []>} : vector<16x16xf32>, vector<16x16xf32>, vector<16x16xf32> -> vector<16x16xf32>
    %cst_30 = arith.constant dense<0.000000e+00> : vector<16x16xf32>
    %32 = tpu.matmul %0, %31, %cst_30 {dimension_numbers = #tpu.dot_dimension_numbers<[1], [0], [0], [1], [0, 0, 1, 1], [], []>} : vector<16x16xf32>, vector<16x16xf32>, vector<16x16xf32> -> vector<16x16xf32>
    %cst_31 = arith.constant 0.111111112 : f32
    %33 = vector.broadcast %cst_31 : f32 to vector<16x16xf32>
    %34 = arith.mulf %32, %33 : vector<16x16xf32>
    %c3_32 = arith.constant 3 : index
    %c0_33 = arith.constant 0 : index
    %c0_34 = arith.constant 0 : index
    %35 = vector.load %arg4[%c3_32, %c0_33, %c0_34] : memref<8x16x16xf32, #tpu.memory_space<vmem>>, vector<1x16x16xf32>
    %36 = vector.shape_cast %35 : vector<1x16x16xf32> to vector<16x16xf32>
    %37 = vector.shape_cast %34 : vector<16x16xf32> to vector<1x16x16xf32>
    tpu.vector_store %arg4[%c3_32, %c0_33, %c0_34], %37 {strides = array<i32>} : memref<8x16x16xf32, #tpu.memory_space<vmem>>, vector<1x16x16xf32>,
    %c4 = arith.constant 4 : index
    %c0_35 = arith.constant 0 : index
    %c0_36 = arith.constant 0 : index
    %38 = vector.load %arg3[%c4, %c0_35, %c0_36] : memref<8x16x16xf32, #tpu.memory_space<vmem>>, vector<1x16x16xf32>
    %39 = vector.shape_cast %38 : vector<1x16x16xf32> to vector<16x16xf32>
    %cst_37 = arith.constant dense<0.000000e+00> : vector<16x16xf32>
    %40 = tpu.matmul %39, %1, %cst_37 {dimension_numbers = #tpu.dot_dimension_numbers<[1], [0], [0], [1], [0, 0, 1, 1], [], []>} : vector<16x16xf32>, vector<16x16xf32>, vector<16x16xf32> -> vector<16x16xf32>
    %cst_38 = arith.constant dense<0.000000e+00> : vector<16x16xf32>
    %41 = tpu.matmul %0, %40, %cst_38 {dimension_numbers = #tpu.dot_dimension_numbers<[1], [0], [0], [1], [0, 0, 1, 1], [], []>} : vector<16x16xf32>, vector<16x16xf32>, vector<16x16xf32> -> vector<16x16xf32>
    %cst_39 = arith.constant 0.111111112 : f32
    %42 = vector.broadcast %cst_39 : f32 to vector<16x16xf32>
    %43 = arith.mulf %41, %42 : vector<16x16xf32>
    %c4_40 = arith.constant 4 : index
    %c0_41 = arith.constant 0 : index
    %c0_42 = arith.constant 0 : index
    %44 = vector.load %arg4[%c4_40, %c0_41, %c0_42] : memref<8x16x16xf32, #tpu.memory_space<vmem>>, vector<1x16x16xf32>
    %45 = vector.shape_cast %44 : vector<1x16x16xf32> to vector<16x16xf32>
    %46 = vector.shape_cast %43 : vector<16x16xf32> to vector<1x16x16xf32>
    tpu.vector_store %arg4[%c4_40, %c0_41, %c0_42], %46 {strides = array<i32>} : memref<8x16x16xf32, #tpu.memory_space<vmem>>, vector<1x16x16xf32>,
    %c5 = arith.constant 5 : index
    %c0_43 = arith.constant 0 : index
    %c0_44 = arith.constant 0 : index
    %47 = vector.load %arg3[%c5, %c0_43, %c0_44] : memref<8x16x16xf32, #tpu.memory_space<vmem>>, vector<1x16x16xf32>
    %48 = vector.shape_cast %47 : vector<1x16x16xf32> to vector<16x16xf32>
    %cst_45 = arith.constant dense<0.000000e+00> : vector<16x16xf32>
    %49 = tpu.matmul %48, %1, %cst_45 {dimension_numbers = #tpu.dot_dimension_numbers<[1], [0], [0], [1], [0, 0, 1, 1], [], []>} : vector<16x16xf32>, vector<16x16xf32>, vector<16x16xf32> -> vector<16x16xf32>
    %cst_46 = arith.constant dense<0.000000e+00> : vector<16x16xf32>
    %50 = tpu.matmul %0, %49, %cst_46 {dimension_numbers = #tpu.dot_dimension_numbers<[1], [0], [0], [1], [0, 0, 1, 1], [], []>} : vector<16x16xf32>, vector<16x16xf32>, vector<16x16xf32> -> vector<16x16xf32>
    %cst_47 = arith.constant 0.111111112 : f32
    %51 = vector.broadcast %cst_47 : f32 to vector<16x16xf32>
    %52 = arith.mulf %50, %51 : vector<16x16xf32>
    %c5_48 = arith.constant 5 : index
    %c0_49 = arith.constant 0 : index
    %c0_50 = arith.constant 0 : index
    %53 = vector.load %arg4[%c5_48, %c0_49, %c0_50] : memref<8x16x16xf32, #tpu.memory_space<vmem>>, vector<1x16x16xf32>
    %54 = vector.shape_cast %53 : vector<1x16x16xf32> to vector<16x16xf32>
    %55 = vector.shape_cast %52 : vector<16x16xf32> to vector<1x16x16xf32>
    tpu.vector_store %arg4[%c5_48, %c0_49, %c0_50], %55 {strides = array<i32>} : memref<8x16x16xf32, #tpu.memory_space<vmem>>, vector<1x16x16xf32>,
    %c6 = arith.constant 6 : index
    %c0_51 = arith.constant 0 : index
    %c0_52 = arith.constant 0 : index
    %56 = vector.load %arg3[%c6, %c0_51, %c0_52] : memref<8x16x16xf32, #tpu.memory_space<vmem>>, vector<1x16x16xf32>
    %57 = vector.shape_cast %56 : vector<1x16x16xf32> to vector<16x16xf32>
    %cst_53 = arith.constant dense<0.000000e+00> : vector<16x16xf32>
    %58 = tpu.matmul %57, %1, %cst_53 {dimension_numbers = #tpu.dot_dimension_numbers<[1], [0], [0], [1], [0, 0, 1, 1], [], []>} : vector<16x16xf32>, vector<16x16xf32>, vector<16x16xf32> -> vector<16x16xf32>
    %cst_54 = arith.constant dense<0.000000e+00> : vector<16x16xf32>
    %59 = tpu.matmul %0, %58, %cst_54 {dimension_numbers = #tpu.dot_dimension_numbers<[1], [0], [0], [1], [0, 0, 1, 1], [], []>} : vector<16x16xf32>, vector<16x16xf32>, vector<16x16xf32> -> vector<16x16xf32>
    %cst_55 = arith.constant 0.111111112 : f32
    %60 = vector.broadcast %cst_55 : f32 to vector<16x16xf32>
    %61 = arith.mulf %59, %60 : vector<16x16xf32>
    %c6_56 = arith.constant 6 : index
    %c0_57 = arith.constant 0 : index
    %c0_58 = arith.constant 0 : index
    %62 = vector.load %arg4[%c6_56, %c0_57, %c0_58] : memref<8x16x16xf32, #tpu.memory_space<vmem>>, vector<1x16x16xf32>
    %63 = vector.shape_cast %62 : vector<1x16x16xf32> to vector<16x16xf32>
    %64 = vector.shape_cast %61 : vector<16x16xf32> to vector<1x16x16xf32>
    tpu.vector_store %arg4[%c6_56, %c0_57, %c0_58], %64 {strides = array<i32>} : memref<8x16x16xf32, #tpu.memory_space<vmem>>, vector<1x16x16xf32>,
    %c7 = arith.constant 7 : index
    %c0_59 = arith.constant 0 : index
    %c0_60 = arith.constant 0 : index
    %65 = vector.load %arg3[%c7, %c0_59, %c0_60] : memref<8x16x16xf32, #tpu.memory_space<vmem>>, vector<1x16x16xf32>
    %66 = vector.shape_cast %65 : vector<1x16x16xf32> to vector<16x16xf32>
    %cst_61 = arith.constant dense<0.000000e+00> : vector<16x16xf32>
    %67 = tpu.matmul %66, %1, %cst_61 {dimension_numbers = #tpu.dot_dimension_numbers<[1], [0], [0], [1], [0, 0, 1, 1], [], []>} : vector<16x16xf32>, vector<16x16xf32>, vector<16x16xf32> -> vector<16x16xf32>
    %cst_62 = arith.constant dense<0.000000e+00> : vector<16x16xf32>
    %68 = tpu.matmul %0, %67, %cst_62 {dimension_numbers = #tpu.dot_dimension_numbers<[1], [0], [0], [1], [0, 0, 1, 1], [], []>} : vector<16x16xf32>, vector<16x16xf32>, vector<16x16xf32> -> vector<16x16xf32>
    %cst_63 = arith.constant 0.111111112 : f32
    %69 = vector.broadcast %cst_63 : f32 to vector<16x16xf32>
    %70 = arith.mulf %68, %69 : vector<16x16xf32>
    %c7_64 = arith.constant 7 : index
    %c0_65 = arith.constant 0 : index
    %c0_66 = arith.constant 0 : index
    %71 = vector.load %arg4[%c7_64, %c0_65, %c0_66] : memref<8x16x16xf32, #tpu.memory_space<vmem>>, vector<1x16x16xf32>
    %72 = vector.shape_cast %71 : vector<1x16x16xf32> to vector<16x16xf32>
    %73 = vector.shape_cast %70 : vector<16x16xf32> to vector<1x16x16xf32>
    tpu.vector_store %arg4[%c7_64, %c0_65, %c0_66], %73 {strides = array<i32>} : memref<8x16x16xf32, #tpu.memory_space<vmem>>, vector<1x16x16xf32>,
    return
  }
  func.func @transform_0(%arg0: i32) -> (i32, i32) {
    %c0_i32 = arith.constant 0 : i32
    %c0_i32_0 = arith.constant 0 : i32
    %c0_i32_1 = arith.constant 0 : i32
    return %c0_i32, %c0_i32_0 : i32, i32
  }
  func.func @transform_1(%arg0: i32) -> (i32, i32) {
    %c0_i32 = arith.constant 0 : i32
    %c0_i32_0 = arith.constant 0 : i32
    %c0_i32_1 = arith.constant 0 : i32
    return %c0_i32, %c0_i32_0 : i32, i32
  }
  func.func @transform_2(%arg0: i32) -> (i32, i32, i32) {
    %c0_i32 = arith.constant 0 : i32
    %c0_i32_0 = arith.constant 0 : i32
    %c0_i32_1 = arith.constant 0 : i32
    return %arg0, %c0_i32, %c0_i32_0 : i32, i32, i32
  }
  func.func @transform_3(%arg0: i32) -> (i32, i32, i32) {
    %c0_i32 = arith.constant 0 : i32
    %c0_i32_0 = arith.constant 0 : i32
    %c0_i32_1 = arith.constant 0 : i32
    return %arg0, %c0_i32, %c0_i32_0 : i32, i32, i32
  }
}

</mosaic_0001>

<bundles_post_ra>
// kernel: tpu_custom_call.1
= control target key start
LH: loop header
LB: loop body
LE: loop exit
PB: predicated region body
PF: predicated region fallthrough
CT: control target
= control target key end

     0   :  { %8 = vsyncpa [#allocation3], 0  ;;  %s1908_s0 = inlined_call_operand.hbm [shape: f32[16,16], index: 0, kind: input, shape index: {}]   ;;  %s1909_s1 = inlined_call_operand.hbm [shape: f32[16,16], index: 1, kind: input, shape index: {}]   ;;  %s1910_s2 = inlined_call_operand.hbm [shape: f32[8,16,16], index: 2, kind: input, shape index: {}]   ;;  %s1911_s3 = inlined_call_operand.hbm [shape: f32[8,16,16], index: 3, kind: output, shape index: {}]  }
   0x1   :  { %9 = vsyncpa [#allocation6], 0 }
   0x2   :  { %10 = vsyncpa [#allocation4], 0  ;;  %s1767_s12 = smov [#allocation5]   ;;  %s1768_s14 = smov [#allocation2]  }
   0x3   :  { %s28_s13 = sshll.u32 %s1767_s12, 4  ;;  %s16_s15 = sshll.u32 %s1768_s14, 4  ;;  %s29_s13 = int_to_ptr.vmem [resolvable:$true] %s28_s13  ;;  %s1793_s15 = int_to_ptr.vmem [resolvable:$true] %s16_s15 }
   0x4   :  { %s1673_s18 = scalar_lea.hbm %s1909_s1, 256 }
   0x5   :  { %p1674_p0 = scmp.ne.s32.totalorder %s1909_s1, %s1673_s18  ;;  %p1677_p1 = scmp.lt.u32.totalorder %s1673_s18, %s1909_s1 }
   0x7   :  { %p1679_p2 = pnand %p1677_p1, %p1674_p0 }
   0x9   :  { %1682 = shalt.err (!%p1679_p2)
}
   0xa   :  { %s1683_s23 = scalar_lea.vmem %s29_s13, 256  ;;  %p1688_p4 = scmp.lt.s32.totalorder %s29_s13, %s29_s13 }
   0xb   :  { %p1684_p3 = scmp.ne.s32.totalorder %s29_s13, %s1683_s23  ;;  %p1689_p5 = scmp.lt.s32.totalorder %s1683_s23, %s1683_s23 }
   0xd   :  { %p1690_p6 = por %p1689_p5, %p1688_p4 }
   0xf   :  { %p1691_p7 = pnand %p1690_p6, %p1684_p3 }
  0x11   :  { %1694 = shalt.err (!%p1691_p7)
}
  0x12   :  { %s1769_s24 = smov 128   ;;  %s1770_s25 = smov 8  }
  0x13   :  { %34 = dma.hbm_to_vmem [thread:$0]  %s1909_s1, 256, %s29_s13, [#allocation6], %s1769_s24, %s1769_s24, %s1770_s25  }
  0x14   :  { %s1695_s30 = scalar_lea.hbm %s1908_s0, 256 }
  0x15   :  { %p1696_p8 = scmp.ne.s32.totalorder %s1908_s0, %s1695_s30  ;;  %p1699_p9 = scmp.lt.u32.totalorder %s1695_s30, %s1908_s0 }
  0x17   :  { %p1701_p10 = pnand %p1699_p9, %p1696_p8 }
  0x19   :  { %1704 = shalt.err (!%p1701_p10)
}
  0x1a   :  { %s1705_s8 = scalar_lea.vmem %s1793_s15, 256  ;;  %p1710_p12 = scmp.lt.s32.totalorder %s1793_s15, %s1793_s15 }
  0x1b   :  { %p1706_p11 = scmp.ne.s32.totalorder %s1793_s15, %s1705_s8  ;;  %p1711_p13 = scmp.lt.s32.totalorder %s1705_s8, %s1705_s8 }
  0x1d   :  { %p1712_p0 = por %p1711_p13, %p1710_p12 }
  0x1f   :  { %p1713_p1 = pnand %p1712_p0, %p1706_p11 }
  0x21   :  { %1716 = shalt.err (!%p1713_p1)
}
  0x22   :  { %22 = dma.hbm_to_vmem [thread:$0]  %s1908_s0, 256, %s1793_s15, [#allocation3], %s1769_s24, %s1769_s24, %s1770_s25  }
  0x23   :  { %s1771_s10 = smov [#allocation7]   ;;  %s1717_s14 = scalar_lea.hbm %s1910_s2, 2048 }
  0x24   :  { %s40_s11 = sshll.u32 %s1771_s10, 4  ;;  %p1718_p2 = scmp.ne.s32.totalorder %s1910_s2, %s1717_s14  ;;  %s41_s11 = int_to_ptr.vmem [resolvable:$true] %s40_s11 }
  0x25   :  { %p1721_p3 = scmp.lt.u32.totalorder %s1717_s14, %s1910_s2 }
  0x27   :  { %p1723_p4 = pnand %p1721_p3, %p1718_p2 }
  0x29   :  { %1726 = shalt.err (!%p1723_p4)
}
  0x2a   :  { %s1727_s20 = scalar_lea.vmem %s41_s11, 2048  ;;  %p1732_p6 = scmp.lt.s32.totalorder %s41_s11, %s41_s11 }
  0x2b   :  { %p1728_p5 = scmp.ne.s32.totalorder %s41_s11, %s1727_s20  ;;  %p1733_p7 = scmp.lt.s32.totalorder %s1727_s20, %s1727_s20 }
  0x2d   :  { %p1734_p8 = por %p1733_p7, %p1732_p6 }
  0x2f   :  { %p1735_p9 = pnand %p1734_p8, %p1728_p5 }
  0x31   :  { %1738 = shalt.err (!%p1735_p9)
}
  0x32   :  { %46 = dma.hbm_to_vmem [thread:$0]  %s1910_s2, 2048, %s41_s11, [#allocation6], %s1769_s24, %s1769_s24, %s1770_s25  }
  0x33   :  { %1761 = dma.done.wait [#allocation3], 256  }
  0x34   :  { %1762 = vsyncadd [#allocation3], 4294967040 }
  0x35   :  { %1763 = dma.done.wait [#allocation6], 2304  }
  0x36   :  { %1764 = vsyncadd [#allocation6], 4294964992  ;;  %vm62_vm0 = vcmask 130048   ;;  %v58_v0 = vld [vmem:[#allocation5] sm:$0xff]  ;;  %v59_v1 = vld [vmem:[#allocation5 + $0x8] sm:$0xff]  ;;  %s1772_s2 = smov [#allocation8]  }
  0x37   :  { %v60_v2 = vld [vmem:[#allocation7] sm:$0xff]  ;;  %v1603_v3 = vpack.c.bf16 %v59_v1, %v58_v0  ;;  %v61_v4 = vld [vmem:[#allocation7 + $0x8] sm:$0xff]  ;;  %v230_v5 = vld [vmem:[#allocation7 + $0x10] sm:$0xff]  ;;  %s1382_s21 = sshll.u32 %s1772_s2, 4  ;;  %s1383_s21 = int_to_ptr.vmem [resolvable:$true] %s1382_s21 }
  0x38   :  { %1495 = vmatprep.mubr.msk.f32.mxu0 %vm62_vm0, %v60_v2  ;;  %v231_v6 = vld [vmem:[#allocation7 + $0x18] sm:$0xff]  ;;  %v394_v7 = vld [vmem:[#allocation7 + $0x20] sm:$0xff]  ;;  %v395_v8 = vld [vmem:[#allocation7 + $0x28] sm:$0xff]  ;;  %s1739_s22 = scalar_lea.vmem %s1383_s21, 2048  ;;  %p1744_p11 = scmp.lt.s32.totalorder %s1383_s21, %s1383_s21 }
  0x39   :  { %1604 = vmatprep.subr.bf16.mxu0 %v1603_v3  ;;  %v558_v9 = vld [vmem:[#allocation7 + $0x30] sm:$0xff]  ;;  %v559_v10 = vld [vmem:[#allocation7 + $0x38] sm:$0xff]  ;;  %v722_v11 = vld [vmem:[#allocation7 + $0x40] sm:$0xff]  ;;  %p1740_p10 = scmp.ne.s32.totalorder %s1383_s21, %s1739_s22  ;;  %p1745_p12 = scmp.lt.s32.totalorder %s1739_s22, %s1739_s22 }
  0x3a   :  { %1606 = vmatpush3.bf16.msra.mxu0 %v1603_v3  ;;  %v723_v12 = vld [vmem:[#allocation7 + $0x48] sm:$0xff]  ;;  %v886_v13 = vld [vmem:[#allocation7 + $0x50] sm:$0xff]  ;;  %v887_v14 = vld [vmem:[#allocation7 + $0x58] sm:$0xff] }
  0x3b   :  { %1612 = vmatprep.subr.bf16.mxu0 %v1603_v3  ;;  %v1050_v15 = vld [vmem:[#allocation7 + $0x60] sm:$0xff]  ;;  %v1051_v16 = vld [vmem:[#allocation7 + $0x68] sm:$0xff]  ;;  %v1214_v17 = vld [vmem:[#allocation7 + $0x70] sm:$0xff]  ;;  %p1746_p13 = por %p1745_p12, %p1744_p11 }
  0x3c   :  { %v1215_v18 = vld [vmem:[#allocation7 + $0x78] sm:$0xff]  ;;  %v56_v19 = vld [vmem:[#allocation2] sm:$0xff]  ;;  %v57_v25 = vld [vmem:[#allocation2 + $0x8] sm:$0xff] }
  0x3d   :  { %1496 = vmatmul.mubr.msk.f32.vlgmr.msra.gmra.mrb[0].mxu0 %vm62_vm0, %v61_v4  ;;  %1502 = vmatprep.mubr.msk.f32.mxu1 %vm62_vm0, %v56_v19  ;;  %p1747_p0 = pnand %p1746_p13, %p1740_p10 }
  0x3e   :  { %1614 = vmatpush3.bf16.msra.mxu0 %v1603_v3  ;;  %1509 = vmatprep.mubr.msk.f32.mxu0 %vm62_vm0, %v230_v5 }
  0x3f   :  { %1620 = vmatprep.subr.bf16.mxu0 %v1603_v3 }
  0x41   :  { %1510 = vmatmul.mubr.msk.f32.vlgmr.msra.gmra.mrb[2].mxu0 %vm62_vm0, %v231_v6 }
  0x42   :  { %1622 = vmatpush3.bf16.msra.mxu0 %v1603_v3  ;;  %1523 = vmatprep.mubr.msk.f32.mxu0 %vm62_vm0, %v394_v7 }
  0x43   :  { %1628 = vmatprep.subr.bf16.mxu0 %v1603_v3 }
  0x45   :  { %1524 = vmatmul.mubr.msk.f32.vlgmr.msra.gmra.mrb[4].mxu0 %vm62_vm0, %v395_v8 }
  0x46   :  { %1630 = vmatpush3.bf16.msra.mxu0 %v1603_v3  ;;  %1537 = vmatprep.mubr.msk.f32.mxu0 %vm62_vm0, %v558_v9 }
  0x47   :  { %1636 = vmatprep.subr.bf16.mxu0 %v1603_v3 }
  0x49   :  { %1538 = vmatmul.mubr.msk.f32.vlgmr.msra.gmra.mrb[6].mxu0 %vm62_vm0, %v559_v10 }
  0x4a   :  { %1638 = vmatpush3.bf16.msra.mxu0 %v1603_v3  ;;  %1551 = vmatprep.mubr.msk.f32.mxu0 %vm62_vm0, %v722_v11 }
  0x4b   :  { %1644 = vmatprep.subr.bf16.mxu0 %v1603_v3 }
  0x4d   :  { %1552 = vmatmul.mubr.msk.f32.vlgmr.msra.gmra.mrb[8].mxu0 %vm62_vm0, %v723_v12 }
  0x4e   :  { %1646 = vmatpush3.bf16.msra.mxu0 %v1603_v3  ;;  %1565 = vmatprep.mubr.msk.f32.mxu0 %vm62_vm0, %v886_v13 }
  0x4f   :  { %1652 = vmatprep.subr.bf16.mxu0 %v1603_v3 }
  0x51   :  { %1566 = vmatmul.mubr.msk.f32.vlgmr.msra.gmra.mrb[10].mxu0 %vm62_vm0, %v887_v14 }
  0x52   :  { %1654 = vmatpush3.bf16.msra.mxu0 %v1603_v3  ;;  %1579 = vmatprep.mubr.msk.f32.mxu0 %vm62_vm0, %v1050_v15 }
  0x53   :  { %1660 = vmatprep.subr.bf16.mxu0 %v1603_v3 }
  0x55   :  { %1580 = vmatmul.mubr.msk.f32.vlgmr.msra.gmra.mrb[12].mxu0 %vm62_vm0, %v1051_v16 }
  0x56   :  { %1662 = vmatpush3.bf16.msra.mxu0 %v1603_v3  ;;  %1593 = vmatprep.mubr.msk.f32.mxu0 %vm62_vm0, %v1214_v17 }
  0x59   :  { %1594 = vmatmul.mubr.msk.f32.vlgmr.msra.gmra.mrb[14].mxu0 %vm62_vm0, %v1215_v18 }
 0x110   :  { %v1497_v20 = vpop.f32.mrb[0].mxu0 }
 0x111   :  { %v135_v21 = vpop.f32.mrb[1].mxu0 }
 0x112   :  { %v1607_v22 = vpack.c.bf16 %v1497_v20, %v135_v21 }
 0x114   :  { %1608 = vmatprep.subr.bf16.mxu1 %v1607_v22  ;;  %v1511_v23 = vpop.f32.mrb[2].mxu0 }
 0x115   :  { %1610 = vmatpush3.bf16.msra.mxu1 %v1607_v22  ;;  %v304_v24 = vpop.f32.mrb[3].mxu0 }
 0x116   :  { %v1615_v26 = vpack.c.bf16 %v1511_v23, %v304_v24 }
 0x118   :  { %1503 = vmatmul.mubr.msk.f32.vlgmr.msra.gmra.mrb[0].mxu1 %vm62_vm0, %v57_v25  ;;  %1616 = vmatprep.subr.bf16.mxu1 %v1615_v26  ;;  %v1525_v27 = vpop.f32.mrb[4].mxu0 }
 0x119   :  { %1618 = vmatpush3.bf16.msra.mxu1 %v1615_v26  ;;  %v468_v28 = vpop.f32.mrb[5].mxu0  ;;  %1516 = vmatprep.mubr.msk.f32.mxu1 %vm62_vm0, %v56_v19 }
 0x11a   :  { %v1623_v29 = vpack.c.bf16 %v1525_v27, %v468_v28 }
 0x11c   :  { %1517 = vmatmul.mubr.msk.f32.vlgmr.msra.gmra.mrb[2].mxu1 %vm62_vm0, %v57_v25  ;;  %1624 = vmatprep.subr.bf16.mxu1 %v1623_v29  ;;  %v1539_v30 = vpop.f32.mrb[6].mxu0 }
 0x11d   :  { %1626 = vmatpush3.bf16.msra.mxu1 %v1623_v29  ;;  %v632_v31 = vpop.f32.mrb[7].mxu0  ;;  %1530 = vmatprep.mubr.msk.f32.mxu1 %vm62_vm0, %v56_v19 }
 0x11e   :  { %v1631_v32 = vpack.c.bf16 %v1539_v30, %v632_v31 }
 0x120   :  { %1531 = vmatmul.mubr.msk.f32.vlgmr.msra.gmra.mrb[4].mxu1 %vm62_vm0, %v57_v25  ;;  %1632 = vmatprep.subr.bf16.mxu1 %v1631_v32  ;;  %v1553_v33 = vpop.f32.mrb[8].mxu0 }
 0x121   :  { %1634 = vmatpush3.bf16.msra.mxu1 %v1631_v32  ;;  %v796_v34 = vpop.f32.mrb[9].mxu0  ;;  %1544 = vmatprep.mubr.msk.f32.mxu1 %vm62_vm0, %v56_v19 }
 0x122   :  { %v1639_v35 = vpack.c.bf16 %v1553_v33, %v796_v34 }
 0x124   :  { %1545 = vmatmul.mubr.msk.f32.vlgmr.msra.gmra.mrb[6].mxu1 %vm62_vm0, %v57_v25  ;;  %1640 = vmatprep.subr.bf16.mxu1 %v1639_v35  ;;  %v1567_v36 = vpop.f32.mrb[10].mxu0 }
 0x125   :  { %1642 = vmatpush3.bf16.msra.mxu1 %v1639_v35  ;;  %v960_v37 = vpop.f32.mrb[11].mxu0  ;;  %1558 = vmatprep.mubr.msk.f32.mxu1 %vm62_vm0, %v56_v19 }
 0x126   :  { %v1647_v38 = vpack.c.bf16 %v1567_v36, %v960_v37 }
 0x128   :  { %1559 = vmatmul.mubr.msk.f32.vlgmr.msra.gmra.mrb[8].mxu1 %vm62_vm0, %v57_v25  ;;  %1648 = vmatprep.subr.bf16.mxu1 %v1647_v38  ;;  %v1581_v39 = vpop.f32.mrb[12].mxu0 }
 0x129   :  { %1650 = vmatpush3.bf16.msra.mxu1 %v1647_v38  ;;  %v1124_v40 = vpop.f32.mrb[13].mxu0  ;;  %1572 = vmatprep.mubr.msk.f32.mxu1 %vm62_vm0, %v56_v19 }
 0x12a   :  { %v1655_v41 = vpack.c.bf16 %v1581_v39, %v1124_v40 }
 0x12c   :  { %1573 = vmatmul.mubr.msk.f32.vlgmr.msra.gmra.mrb[10].mxu1 %vm62_vm0, %v57_v25  ;;  %1656 = vmatprep.subr.bf16.mxu1 %v1655_v41  ;;  %v1595_v42 = vpop.f32.mrb[14].mxu0 }
 0x12d   :  { %1658 = vmatpush3.bf16.msra.mxu1 %v1655_v41  ;;  %v1288_v43 = vpop.f32.mrb[15].mxu0  ;;  %1586 = vmatprep.mubr.msk.f32.mxu1 %vm62_vm0, %v56_v19 }
 0x12e   :  { %v1663_v44 = vpack.c.bf16 %v1595_v42, %v1288_v43 }
 0x130   :  { %1587 = vmatmul.mubr.msk.f32.vlgmr.msra.gmra.mrb[12].mxu1 %vm62_vm0, %v57_v25  ;;  %1664 = vmatprep.subr.bf16.mxu1 %v1663_v44 }
 0x131   :  { %1666 = vmatpush3.bf16.msra.mxu1 %v1663_v44  ;;  %1600 = vmatprep.mubr.msk.f32.mxu1 %vm62_vm0, %v56_v19 }
 0x134   :  { %1601 = vmatmul.mubr.msk.f32.vlgmr.msra.gmra.mrb[14].mxu1 %vm62_vm0, %v57_v25 }
 0x1eb   :  { %v1504_v45 = vpop.f32.mrb[0].mxu1 }
 0x1ec   :  { %v226_v46 = vmul.f32 0.11111111, %v1504_v45  ;;  %v216_v47 = vpop.f32.mrb[1].mxu1 }
 0x1ed   :  { %v225_v48 = vmul.f32 0.11111111, %v216_v47 }
 0x1ee   :  { %228 = vst.msk [vmem:[#allocation8 + $0x8] sm:$0xff] %vm62_vm0, %v226_v46 }
 0x1ef   :  { %227 = vst.msk [vmem:[#allocation8] sm:$0xff] %vm62_vm0, %v225_v48  ;;  %v1518_v49 = vpop.f32.mrb[2].mxu1 }
 0x1f0   :  { %v389_v50 = vmul.f32 0.11111111, %v1518_v49  ;;  %v379_v51 = vpop.f32.mrb[3].mxu1 }
 0x1f1   :  { %v388_v52 = vmul.f32 0.11111111, %v379_v51 }
 0x1f2   :  { %392 = vst.msk [vmem:[#allocation8 + $0x18] sm:$0xff] %vm62_vm0, %v389_v50 }
 0x1f3   :  { %391 = vst.msk [vmem:[#allocation8 + $0x10] sm:$0xff] %vm62_vm0, %v388_v52  ;;  %v1532_v53 = vpop.f32.mrb[4].mxu1 }
 0x1f4   :  { %v553_v54 = vmul.f32 0.11111111, %v1532_v53  ;;  %v543_v55 = vpop.f32.mrb[5].mxu1 }
 0x1f5   :  { %v552_v56 = vmul.f32 0.11111111, %v543_v55 }
 0x1f6   :  { %556 = vst.msk [vmem:[#allocation8 + $0x28] sm:$0xff] %vm62_vm0, %v553_v54 }
 0x1f7   :  { %555 = vst.msk [vmem:[#allocation8 + $0x20] sm:$0xff] %vm62_vm0, %v552_v56  ;;  %v1546_v57 = vpop.f32.mrb[6].mxu1 }
 0x1f8   :  { %v717_v58 = vmul.f32 0.11111111, %v1546_v57  ;;  %v707_v59 = vpop.f32.mrb[7].mxu1 }
 0x1f9   :  { %v716_v60 = vmul.f32 0.11111111, %v707_v59 }
 0x1fa   :  { %720 = vst.msk [vmem:[#allocation8 + $0x38] sm:$0xff] %vm62_vm0, %v717_v58 }
 0x1fb   :  { %719 = vst.msk [vmem:[#allocation8 + $0x30] sm:$0xff] %vm62_vm0, %v716_v60  ;;  %v1560_v61 = vpop.f32.mrb[8].mxu1 }
 0x1fc   :  { %v881_v62 = vmul.f32 0.11111111, %v1560_v61  ;;  %v871_v63 = vpop.f32.mrb[9].mxu1 }
 0x1fd   :  { %v880_v0 = vmul.f32 0.11111111, %v871_v63 }
 0x1fe   :  { %884 = vst.msk [vmem:[#allocation8 + $0x48] sm:$0xff] %vm62_vm0, %v881_v62 }
 0x1ff   :  { %883 = vst.msk [vmem:[#allocation8 + $0x40] sm:$0xff] %vm62_vm0, %v880_v0  ;;  %v1574_v1 = vpop.f32.mrb[10].mxu1 }
 0x200   :  { %v1045_v2 = vmul.f32 0.11111111, %v1574_v1  ;;  %v1035_v3 = vpop.f32.mrb[11].mxu1 }
 0x201   :  { %v1044_v4 = vmul.f32 0.11111111, %v1035_v3 }
 0x202   :  { %1048 = vst.msk [vmem:[#allocation8 + $0x58] sm:$0xff] %vm62_vm0, %v1045_v2 }
 0x203   :  { %1047 = vst.msk [vmem:[#allocation8 + $0x50] sm:$0xff] %vm62_vm0, %v1044_v4  ;;  %v1588_v5 = vpop.f32.mrb[12].mxu1 }
 0x204   :  { %v1209_v6 = vmul.f32 0.11111111, %v1588_v5  ;;  %v1199_v7 = vpop.f32.mrb[13].mxu1 }
 0x205   :  { %v1208_v8 = vmul.f32 0.11111111, %v1199_v7 }
 0x206   :  { %1212 = vst.msk [vmem:[#allocation8 + $0x68] sm:$0xff] %vm62_vm0, %v1209_v6 }
 0x207   :  { %1211 = vst.msk [vmem:[#allocation8 + $0x60] sm:$0xff] %vm62_vm0, %v1208_v8  ;;  %v1602_v9 = vpop.f32.mrb[14].mxu1 }
 0x208   :  { %v1373_v10 = vmul.f32 0.11111111, %v1602_v9  ;;  %v1363_v11 = vpop.f32.mrb[15].mxu1 }
 0x209   :  { %v1372_v12 = vmul.f32 0.11111111, %v1363_v11 }
 0x20a   :  { %1376 = vst.msk [vmem:[#allocation8 + $0x78] sm:$0xff] %vm62_vm0, %v1373_v10 }
 0x20b   :  { %1375 = vst.msk [vmem:[#allocation8 + $0x70] sm:$0xff] %vm62_vm0, %v1372_v12 }
 0x20c   :  { %1750 = shalt.err (!%p1747_p0)
}
 0x20d   :  { %s1751_s27 = scalar_lea.hbm %s1911_s3, 2048 }
 0x20e   :  { %p1752_p1 = scmp.ne.s32.totalorder %s1911_s3, %s1751_s27  ;;  %p1755_p2 = scmp.lt.u32.totalorder %s1751_s27, %s1911_s3 }
 0x210   :  { %p1757_p3 = pnand %p1755_p2, %p1752_p1 }
 0x212   :  { %1760 = shalt.err (!%p1757_p3)
}
 0x213   :  { %1388 = dma.vmem_to_hbm [thread:$0]  %s1383_s21, 2048, %s1911_s3, [#allocation4], %s1769_s24, %s1769_s24, %s1770_s25  }
 0x214   :  { %1765 = dma.done.wait [#allocation4], 2048  }
 0x215   :  { %1766 = vsyncadd [#allocation4], 4294965248 }
 0x216   :  { %1392 = vsyncpa [#allocation3], 1 }
 0x217   :  { %1393 = vsyncpa [#allocation6], 1 }
 0x218   :  { %1394 = vsyncpa [#allocation4], 1 }

</bundles_post_ra>
